<compile_context>
chip_gen: v7x
topology: tpu7x:2x2x1
jax: 0.10.0
libtpu: 0.0.40
codegen_flags: <defaults>
</compile_context>

<pallas_src>
import functools

import jax
import jax.numpy as jnp
from jax.experimental import pallas as pl
from jax.experimental.pallas import tpu as pltpu

INPUT = 4    # nn.LSTM input_size
HIDDEN = 64  # nn.LSTM hidden_size
OUT = 3      # nn.Linear out_features
B_PAD = 8    # pad batch to a full sublane


def lstm_kernel(x_ref, w_ih_ref, w_hh_ref, b_ref, hc_out_ref, gx_ref):
    """Single invocation: full-sequence input projection + unrolled recurrence.

    x_ref     : (T*Bp, I)   time-major, batch-padded, flattened
    w_ih_ref  : (I, 4H)     gate order [i, f, o, g]
    w_hh_ref  : (H, 4H)     gate order [i, f, o, g]
    b_ref     : (1, 4H)     b_ih + b_hh, same gate order
    hc_out_ref: (Bp, 2H)    lane-dense [h_T | c_T]
    gx_ref    : (T*Bp, 4H)  VMEM scratch for the hoisted input projection
    """
    Bp = hc_out_ref.shape[0]
    H = w_hh_ref.shape[0]
    T = x_ref.shape[0] // Bp

    # One-shot preamble: input projection + bias for all T timesteps.
    # (K = I = 4 is a tiny-K matmul, but it is a single MXU pass off the serial
    #  recurrence path; keeping it on the MXU beats 4 lane-broadcast VPU FMAs
    #  in simplicity and is negligible either way at T=8.)
    gx_ref[...] = (
        jnp.dot(x_ref[...], w_ih_ref[...], preferred_element_type=jnp.float32)
        + b_ref[...]
    )

    # Keep recurrent weights resident across the unrolled loop; the RHS push is
    # loop-invariant, so Mosaic can hoist it.
    w_hh = w_hh_ref[...]

    def step(t, carry):
        h, c = carry
        row = pl.multiple_of(t * Bp, Bp)
        gates = gx_ref[pl.ds(row, Bp), :] + jnp.dot(
            h, w_hh, preferred_element_type=jnp.float32
        )                                           # (Bp, 4H)

        # Gate order [i, f, o, g]:
        #  * sigmoid over the full 4H slab (two 128-lane vregs, no sub-vreg
        #    extract on the EUP input; the wasted sigmoid on the g lanes rides
        #    the otherwise-idle EUP slot),
        #  * tanh only on the trailing H lanes,
        #  * 64-lane carves deferred to the final elementwise combine.
        sg = jax.nn.sigmoid(gates)
        g_t = jnp.tanh(gates[:, 3 * H:4 * H])

        i_g = sg[:, 0 * H:1 * H]
        f_g = sg[:, 1 * H:2 * H]
        o_g = sg[:, 2 * H:3 * H]

        c_new = f_g * c + i_g * g_t
        h_new = o_g * jnp.tanh(c_new)
        return h_new, c_new

    h0 = jnp.zeros((Bp, H), jnp.float32)
    c0 = jnp.zeros((Bp, H), jnp.float32)
    h_T, c_T = jax.lax.fori_loop(0, T, step, (h0, c0), unroll=True)

    # Lane-dense (Bp, 2H) = (8, 128) writeback: [h_T | c_T].
    hc_out_ref[...] = jnp.concatenate([h_T, c_T], axis=1)


def prepare_lstm_params(w_ih, w_hh, b_ih, b_hh):
    """One-time weight preprocessing, hoisted out of the per-call path.

    Reorders PyTorch gates [i, f, g, o] -> [i, f, o, g] (contiguous sigmoid
    slab + trailing tanh slab), transposes to (K, 4H), folds the two biases.
    """
    H = HIDDEN
    perm = jnp.concatenate([
        jnp.arange(0 * H, 1 * H),   # i
        jnp.arange(1 * H, 2 * H),   # f
        jnp.arange(3 * H, 4 * H),   # o
        jnp.arange(2 * H, 3 * H),   # g
    ])
    w_ih_t = jnp.asarray(w_ih)[perm].T                          # (I, 4H)
    w_hh_t = jnp.asarray(w_hh)[perm].T                          # (H, 4H)
    b = (jnp.asarray(b_ih) + jnp.asarray(b_hh))[perm].reshape(1, 4 * H)
    return w_ih_t, w_hh_t, b


@jax.jit
def rnn_forward(x, w_ih_t, w_hh_t, b, w_out, b_out):
    """x: (B, T, INPUT) f32. Returns (B, OUT) f32 (LSTM last hidden + Linear).

    Weights must already be preprocessed via `prepare_lstm_params`.
    """
    B, T, I = x.shape
    assert I == INPUT
    H = HIDDEN
    Bp = B_PAD
    assert B <= Bp

    # Time-major, pad batch to a full sublane, flatten for one big matmul.
    x_tm = jnp.transpose(x, (1, 0, 2))            # (T, B, I)
    x_tm = jnp.pad(x_tm, ((0, 0), (0, Bp - B), (0, 0)))
    x2d = x_tm.reshape(T * Bp, I)                 # (T*Bp, I)

    hc_T = pl.pallas_call(
        lstm_kernel,
        out_shape=jax.ShapeDtypeStruct((Bp, 2 * H), jnp.float32),
        grid_spec=pltpu.PrefetchScalarGridSpec(
            num_scalar_prefetch=0,
            grid=(1,),
            in_specs=[
                pl.BlockSpec((T * Bp, I), lambda i: (0, 0)),     # x (all steps)
                pl.BlockSpec((I, 4 * H), lambda i: (0, 0)),      # W_ih^T
                pl.BlockSpec((H, 4 * H), lambda i: (0, 0)),      # W_hh^T
                pl.BlockSpec((1, 4 * H), lambda i: (0, 0)),      # bias
            ],
            out_specs=pl.BlockSpec((Bp, 2 * H), lambda i: (0, 0)),
            scratch_shapes=[
                pltpu.VMEM((T * Bp, 4 * H), jnp.float32),        # hoisted gx
            ],
        ),
        compiler_params=pltpu.CompilerParams(
            dimension_semantics=("arbitrary",)),
    )(x2d, w_ih_t, w_hh_t, b)

    # Final head (OUT=3 is lane-sparse; kept outside the kernel per review).
    h_T = hc_T[:B, :H]
    return h_T @ w_out.T + b_out


def ref_forward(x, w_ih, w_hh, b_ih, b_hh, w_out, b_out):
    """Pure-JAX reference matching PyTorch LSTM (i,f,g,o) + Linear semantics."""
    B, T, _ = x.shape
    H = HIDDEN
    h = jnp.zeros((B, H), jnp.float32)
    c = jnp.zeros((B, H), jnp.float32)
    for t in range(T):
        gates = x[:, t, :] @ w_ih.T + b_ih + h @ w_hh.T + b_hh
        i = jax.nn.sigmoid(gates[:, 0 * H:1 * H])
        f = jax.nn.sigmoid(gates[:, 1 * H:2 * H])
        g = jnp.tanh(gates[:, 2 * H:3 * H])
        o = jax.nn.sigmoid(gates[:, 3 * H:4 * H])
        c = f * c + i * g
        h = o * jnp.tanh(c)
    return h @ w_out.T + b_out


if __name__ == "__main__":
    key = jax.random.PRNGKey(0)
    k_x, k1, k2, k3, k4, k5, k6 = jax.random.split(key, 7)

    B, T = 2, 8
    x = jax.random.normal(k_x, (B, T, INPUT), dtype=jnp.float32)

    # Deterministic init matching PyTorch default uniform(-1/sqrt(H), 1/sqrt(H)).
    k_lstm = 1.0 / jnp.sqrt(jnp.float32(HIDDEN))
    w_ih = jax.random.uniform(k1, (4 * HIDDEN, INPUT), jnp.float32, -k_lstm, k_lstm)
    w_hh = jax.random.uniform(k2, (4 * HIDDEN, HIDDEN), jnp.float32, -k_lstm, k_lstm)
    b_ih = jax.random.uniform(k3, (4 * HIDDEN,), jnp.float32, -k_lstm, k_lstm)
    b_hh = jax.random.uniform(k4, (4 * HIDDEN,), jnp.float32, -k_lstm, k_lstm)

    k_lin = 1.0 / jnp.sqrt(jnp.float32(HIDDEN))
    w_out = jax.random.uniform(k5, (OUT, HIDDEN), jnp.float32, -k_lin, k_lin)
    b_out = jax.random.uniform(k6, (OUT,), jnp.float32, -k_lin, k_lin)

    # One-time setup (hoisted out of the per-forward path).
    w_ih_t, w_hh_t, b_folded = prepare_lstm_params(w_ih, w_hh, b_ih, b_hh)
    w_ih_t, w_hh_t, b_folded = jax.block_until_ready((w_ih_t, w_hh_t, b_folded))

    out = rnn_forward(x, w_ih_t, w_hh_t, b_folded, w_out, b_out)
    out = jax.block_until_ready(out)

    ref = ref_forward(x, w_ih, w_hh, b_ih, b_hh, w_out, b_out)
    assert out.shape == (B, OUT)
    assert jnp.allclose(out, ref, atol=1e-5, rtol=1e-5), (out, ref)
    print("KERNEL_OK")
</pallas_src>

<mosaic_0001>
module attributes {stable_mosaic.version = 11 : i64} {
  func.func @lstm_kernel(%arg0: i32, %arg1: memref<64x4xf32, #tpu.memory_space<vmem>>, %arg2: memref<4x256xf32, #tpu.memory_space<vmem>>, %arg3: memref<64x256xf32, #tpu.memory_space<vmem>>, %arg4: memref<1x256xf32, #tpu.memory_space<vmem>>, %arg5: memref<8x128xf32, #tpu.memory_space<vmem>>, %arg6: memref<64x256xf32, #tpu.memory_space<vmem>>) attributes {dimension_semantics = [#tpu.dimension_semantics<arbitrary>], iteration_bounds = array<i64: 1>, scalar_prefetch = 0 : i64, scratch_operands = 1 : i64, tpu.core_type = #tpu.core_type<tc>, window_params = [{pipeline_mode = #tpu.pipeline_mode<synchronous>, transform_indices = @transform_0, window_bounds = array<i64: 64, 4>}, {pipeline_mode = #tpu.pipeline_mode<synchronous>, transform_indices = @transform_1, window_bounds = array<i64: 4, 256>}, {pipeline_mode = #tpu.pipeline_mode<synchronous>, transform_indices = @transform_2, window_bounds = array<i64: 64, 256>}, {pipeline_mode = #tpu.pipeline_mode<synchronous>, transform_indices = @transform_3, window_bounds = array<i64: 1, 256>}, {pipeline_mode = #tpu.pipeline_mode<synchronous>, transform_indices = @transform_4, window_bounds = array<i64: 8, 128>}]} {
    %c0 = arith.constant 0 : index
    %c0_0 = arith.constant 0 : index
    %0 = vector.load %arg1[%c0, %c0_0] : memref<64x4xf32, #tpu.memory_space<vmem>>, vector<64x4xf32>
    %c0_1 = arith.constant 0 : index
    %c0_2 = arith.constant 0 : index
    %1 = vector.load %arg2[%c0_1, %c0_2] : memref<4x256xf32, #tpu.memory_space<vmem>>, vector<4x256xf32>
    %cst = arith.constant dense<0.000000e+00> : vector<64x256xf32>
    %2 = tpu.matmul %0, %1, %cst {dimension_numbers = #tpu.dot_dimension_numbers<[1], [0], [0], [1], [0, 0, 1, 1], [], []>} : vector<64x4xf32>, vector<4x256xf32>, vector<64x256xf32> -> vector<64x256xf32>
    %c0_3 = arith.constant 0 : index
    %c0_4 = arith.constant 0 : index
    %3 = vector.load %arg4[%c0_3, %c0_4] : memref<1x256xf32, #tpu.memory_space<vmem>>, vector<1x256xf32>
    %4 = vector.broadcast %3 : vector<1x256xf32> to vector<64x256xf32>
    %5 = arith.addf %2, %4 : vector<64x256xf32>
    %c0_5 = arith.constant 0 : index
    %c0_6 = arith.constant 0 : index
    %6 = vector.load %arg6[%c0_5, %c0_6] : memref<64x256xf32, #tpu.memory_space<vmem>>, vector<64x256xf32>
    tpu.vector_store %arg6[%c0_5, %c0_6], %5 {strides = array<i32>} : memref<64x256xf32, #tpu.memory_space<vmem>>, vector<64x256xf32>,
    %c0_7 = arith.constant 0 : index
    %c0_8 = arith.constant 0 : index
    %7 = vector.load %arg3[%c0_7, %c0_8] : memref<64x256xf32, #tpu.memory_space<vmem>>, vector<64x256xf32>
    %cst_9 = arith.constant 0.000000e+00 : f32
    %8 = vector.broadcast %cst_9 : f32 to vector<8x64xf32>
    %cst_10 = arith.constant 0.000000e+00 : f32
    %9 = vector.broadcast %cst_10 : f32 to vector<8x64xf32>
    %c0_i32 = arith.constant 0 : i32
    %c8_i32 = arith.constant 8 : i32
    %10 = arith.muli %c0_i32, %c8_i32 : i32
    %11 = tpu.assume_multiple %10, 8 : i32
    %12 = arith.index_cast %11 : i32 to index
    %c0_11 = arith.constant 0 : index
    %13 = vector.load %arg6[%12, %c0_11] : memref<64x256xf32, #tpu.memory_space<vmem>>, vector<8x256xf32>
    %cst_12 = arith.constant dense<0.000000e+00> : vector<8x256xf32>
    %14 = tpu.matmul %8, %7, %cst_12 {dimension_numbers = #tpu.dot_dimension_numbers<[1], [0], [0], [1], [0, 0, 1, 1], [], []>} : vector<8x64xf32>, vector<64x256xf32>, vector<8x256xf32> -> vector<8x256xf32>
    %15 = arith.addf %13, %14 : vector<8x256xf32>
    %16 = arith.negf %15 : vector<8x256xf32>
    %17 = math.exp %16 : vector<8x256xf32>
    %cst_13 = arith.constant 1.000000e+00 : f32
    %18 = vector.broadcast %cst_13 : f32 to vector<8x256xf32>
    %19 = arith.addf %18, %17 : vector<8x256xf32>
    %20 = arith.divf %18, %19 : vector<8x256xf32>
    %21 = vector.extract_strided_slice %15 {offsets = [0, 192], sizes = [8, 64], strides = [1, 1]} : vector<8x256xf32> to vector<8x64xf32>
    %22 = math.tanh %21 : vector<8x64xf32>
    %23 = vector.extract_strided_slice %20 {offsets = [0, 0], sizes = [8, 64], strides = [1, 1]} : vector<8x256xf32> to vector<8x64xf32>
    %24 = vector.extract_strided_slice %20 {offsets = [0, 64], sizes = [8, 64], strides = [1, 1]} : vector<8x256xf32> to vector<8x64xf32>
    %25 = vector.extract_strided_slice %20 {offsets = [0, 128], sizes = [8, 64], strides = [1, 1]} : vector<8x256xf32> to vector<8x64xf32>
    %26 = arith.mulf %24, %9 : vector<8x64xf32>
    %27 = arith.mulf %23, %22 : vector<8x64xf32>
    %28 = arith.addf %26, %27 : vector<8x64xf32>
    %29 = math.tanh %28 : vector<8x64xf32>
    %30 = arith.mulf %25, %29 : vector<8x64xf32>
    %c1_i32 = arith.constant 1 : i32
    %c8_i32_14 = arith.constant 8 : i32
    %31 = arith.muli %c1_i32, %c8_i32_14 : i32
    %32 = tpu.assume_multiple %31, 8 : i32
    %33 = arith.index_cast %32 : i32 to index
    %c0_15 = arith.constant 0 : index
    %34 = vector.load %arg6[%33, %c0_15] : memref<64x256xf32, #tpu.memory_space<vmem>>, vector<8x256xf32>
    %cst_16 = arith.constant dense<0.000000e+00> : vector<8x256xf32>
    %35 = tpu.matmul %30, %7, %cst_16 {dimension_numbers = #tpu.dot_dimension_numbers<[1], [0], [0], [1], [0, 0, 1, 1], [], []>} : vector<8x64xf32>, vector<64x256xf32>, vector<8x256xf32> -> vector<8x256xf32>
    %36 = arith.addf %34, %35 : vector<8x256xf32>
    %37 = arith.negf %36 : vector<8x256xf32>
    %38 = math.exp %37 : vector<8x256xf32>
    %cst_17 = arith.constant 1.000000e+00 : f32
    %39 = vector.broadcast %cst_17 : f32 to vector<8x256xf32>
    %40 = arith.addf %39, %38 : vector<8x256xf32>
    %41 = arith.divf %39, %40 : vector<8x256xf32>
    %42 = vector.extract_strided_slice %36 {offsets = [0, 192], sizes = [8, 64], strides = [1, 1]} : vector<8x256xf32> to vector<8x64xf32>
    %43 = math.tanh %42 : vector<8x64xf32>
    %44 = vector.extract_strided_slice %41 {offsets = [0, 0], sizes = [8, 64], strides = [1, 1]} : vector<8x256xf32> to vector<8x64xf32>
    %45 = vector.extract_strided_slice %41 {offsets = [0, 64], sizes = [8, 64], strides = [1, 1]} : vector<8x256xf32> to vector<8x64xf32>
    %46 = vector.extract_strided_slice %41 {offsets = [0, 128], sizes = [8, 64], strides = [1, 1]} : vector<8x256xf32> to vector<8x64xf32>
    %47 = arith.mulf %45, %28 : vector<8x64xf32>
    %48 = arith.mulf %44, %43 : vector<8x64xf32>
    %49 = arith.addf %47, %48 : vector<8x64xf32>
    %50 = math.tanh %49 : vector<8x64xf32>
    %51 = arith.mulf %46, %50 : vector<8x64xf32>
    %c2_i32 = arith.constant 2 : i32
    %c8_i32_18 = arith.constant 8 : i32
    %52 = arith.muli %c2_i32, %c8_i32_18 : i32
    %53 = tpu.assume_multiple %52, 8 : i32
    %54 = arith.index_cast %53 : i32 to index
    %c0_19 = arith.constant 0 : index
    %55 = vector.load %arg6[%54, %c0_19] : memref<64x256xf32, #tpu.memory_space<vmem>>, vector<8x256xf32>
    %cst_20 = arith.constant dense<0.000000e+00> : vector<8x256xf32>
    %56 = tpu.matmul %51, %7, %cst_20 {dimension_numbers = #tpu.dot_dimension_numbers<[1], [0], [0], [1], [0, 0, 1, 1], [], []>} : vector<8x64xf32>, vector<64x256xf32>, vector<8x256xf32> -> vector<8x256xf32>
    %57 = arith.addf %55, %56 : vector<8x256xf32>
    %58 = arith.negf %57 : vector<8x256xf32>
    %59 = math.exp %58 : vector<8x256xf32>
    %cst_21 = arith.constant 1.000000e+00 : f32
    %60 = vector.broadcast %cst_21 : f32 to vector<8x256xf32>
    %61 = arith.addf %60, %59 : vector<8x256xf32>
    %62 = arith.divf %60, %61 : vector<8x256xf32>
    %63 = vector.extract_strided_slice %57 {offsets = [0, 192], sizes = [8, 64], strides = [1, 1]} : vector<8x256xf32> to vector<8x64xf32>
    %64 = math.tanh %63 : vector<8x64xf32>
    %65 = vector.extract_strided_slice %62 {offsets = [0, 0], sizes = [8, 64], strides = [1, 1]} : vector<8x256xf32> to vector<8x64xf32>
    %66 = vector.extract_strided_slice %62 {offsets = [0, 64], sizes = [8, 64], strides = [1, 1]} : vector<8x256xf32> to vector<8x64xf32>
    %67 = vector.extract_strided_slice %62 {offsets = [0, 128], sizes = [8, 64], strides = [1, 1]} : vector<8x256xf32> to vector<8x64xf32>
    %68 = arith.mulf %66, %49 : vector<8x64xf32>
    %69 = arith.mulf %65, %64 : vector<8x64xf32>
    %70 = arith.addf %68, %69 : vector<8x64xf32>
    %71 = math.tanh %70 : vector<8x64xf32>
    %72 = arith.mulf %67, %71 : vector<8x64xf32>
    %c3_i32 = arith.constant 3 : i32
    %c8_i32_22 = arith.constant 8 : i32
    %73 = arith.muli %c3_i32, %c8_i32_22 : i32
    %74 = tpu.assume_multiple %73, 8 : i32
    %75 = arith.index_cast %74 : i32 to index
    %c0_23 = arith.constant 0 : index
    %76 = vector.load %arg6[%75, %c0_23] : memref<64x256xf32, #tpu.memory_space<vmem>>, vector<8x256xf32>
    %cst_24 = arith.constant dense<0.000000e+00> : vector<8x256xf32>
    %77 = tpu.matmul %72, %7, %cst_24 {dimension_numbers = #tpu.dot_dimension_numbers<[1], [0], [0], [1], [0, 0, 1, 1], [], []>} : vector<8x64xf32>, vector<64x256xf32>, vector<8x256xf32> -> vector<8x256xf32>
    %78 = arith.addf %76, %77 : vector<8x256xf32>
    %79 = arith.negf %78 : vector<8x256xf32>
    %80 = math.exp %79 : vector<8x256xf32>
    %cst_25 = arith.constant 1.000000e+00 : f32
    %81 = vector.broadcast %cst_25 : f32 to vector<8x256xf32>
    %82 = arith.addf %81, %80 : vector<8x256xf32>
    %83 = arith.divf %81, %82 : vector<8x256xf32>
    %84 = vector.extract_strided_slice %78 {offsets = [0, 192], sizes = [8, 64], strides = [1, 1]} : vector<8x256xf32> to vector<8x64xf32>
    %85 = math.tanh %84 : vector<8x64xf32>
    %86 = vector.extract_strided_slice %83 {offsets = [0, 0], sizes = [8, 64], strides = [1, 1]} : vector<8x256xf32> to vector<8x64xf32>
    %87 = vector.extract_strided_slice %83 {offsets = [0, 64], sizes = [8, 64], strides = [1, 1]} : vector<8x256xf32> to vector<8x64xf32>
    %88 = vector.extract_strided_slice %83 {offsets = [0, 128], sizes = [8, 64], strides = [1, 1]} : vector<8x256xf32> to vector<8x64xf32>
    %89 = arith.mulf %87, %70 : vector<8x64xf32>
    %90 = arith.mulf %86, %85 : vector<8x64xf32>
    %91 = arith.addf %89, %90 : vector<8x64xf32>
    %92 = math.tanh %91 : vector<8x64xf32>
    %93 = arith.mulf %88, %92 : vector<8x64xf32>
    %c4_i32 = arith.constant 4 : i32
    %c8_i32_26 = arith.constant 8 : i32
    %94 = arith.muli %c4_i32, %c8_i32_26 : i32
    %95 = tpu.assume_multiple %94, 8 : i32
    %96 = arith.index_cast %95 : i32 to index
    %c0_27 = arith.constant 0 : index
    %97 = vector.load %arg6[%96, %c0_27] : memref<64x256xf32, #tpu.memory_space<vmem>>, vector<8x256xf32>
    %cst_28 = arith.constant dense<0.000000e+00> : vector<8x256xf32>
    %98 = tpu.matmul %93, %7, %cst_28 {dimension_numbers = #tpu.dot_dimension_numbers<[1], [0], [0], [1], [0, 0, 1, 1], [], []>} : vector<8x64xf32>, vector<64x256xf32>, vector<8x256xf32> -> vector<8x256xf32>
    %99 = arith.addf %97, %98 : vector<8x256xf32>
    %100 = arith.negf %99 : vector<8x256xf32>
    %101 = math.exp %100 : vector<8x256xf32>
    %cst_29 = arith.constant 1.000000e+00 : f32
    %102 = vector.broadcast %cst_29 : f32 to vector<8x256xf32>
    %103 = arith.addf %102, %101 : vector<8x256xf32>
    %104 = arith.divf %102, %103 : vector<8x256xf32>
    %105 = vector.extract_strided_slice %99 {offsets = [0, 192], sizes = [8, 64], strides = [1, 1]} : vector<8x256xf32> to vector<8x64xf32>
    %106 = math.tanh %105 : vector<8x64xf32>
    %107 = vector.extract_strided_slice %104 {offsets = [0, 0], sizes = [8, 64], strides = [1, 1]} : vector<8x256xf32> to vector<8x64xf32>
    %108 = vector.extract_strided_slice %104 {offsets = [0, 64], sizes = [8, 64], strides = [1, 1]} : vector<8x256xf32> to vector<8x64xf32>
    %109 = vector.extract_strided_slice %104 {offsets = [0, 128], sizes = [8, 64], strides = [1, 1]} : vector<8x256xf32> to vector<8x64xf32>
    %110 = arith.mulf %108, %91 : vector<8x64xf32>
    %111 = arith.mulf %107, %106 : vector<8x64xf32>
    %112 = arith.addf %110, %111 : vector<8x64xf32>
    %113 = math.tanh %112 : vector<8x64xf32>
    %114 = arith.mulf %109, %113 : vector<8x64xf32>
    %c5_i32 = arith.constant 5 : i32
    %c8_i32_30 = arith.constant 8 : i32
    %115 = arith.muli %c5_i32, %c8_i32_30 : i32
    %116 = tpu.assume_multiple %115, 8 : i32
    %117 = arith.index_cast %116 : i32 to index
    %c0_31 = arith.constant 0 : index
    %118 = vector.load %arg6[%117, %c0_31] : memref<64x256xf32, #tpu.memory_space<vmem>>, vector<8x256xf32>
    %cst_32 = arith.constant dense<0.000000e+00> : vector<8x256xf32>
    %119 = tpu.matmul %114, %7, %cst_32 {dimension_numbers = #tpu.dot_dimension_numbers<[1], [0], [0], [1], [0, 0, 1, 1], [], []>} : vector<8x64xf32>, vector<64x256xf32>, vector<8x256xf32> -> vector<8x256xf32>
    %120 = arith.addf %118, %119 : vector<8x256xf32>
    %121 = arith.negf %120 : vector<8x256xf32>
    %122 = math.exp %121 : vector<8x256xf32>
    %cst_33 = arith.constant 1.000000e+00 : f32
    %123 = vector.broadcast %cst_33 : f32 to vector<8x256xf32>
    %124 = arith.addf %123, %122 : vector<8x256xf32>
    %125 = arith.divf %123, %124 : vector<8x256xf32>
    %126 = vector.extract_strided_slice %120 {offsets = [0, 192], sizes = [8, 64], strides = [1, 1]} : vector<8x256xf32> to vector<8x64xf32>
    %127 = math.tanh %126 : vector<8x64xf32>
    %128 = vector.extract_strided_slice %125 {offsets = [0, 0], sizes = [8, 64], strides = [1, 1]} : vector<8x256xf32> to vector<8x64xf32>
    %129 = vector.extract_strided_slice %125 {offsets = [0, 64], sizes = [8, 64], strides = [1, 1]} : vector<8x256xf32> to vector<8x64xf32>
    %130 = vector.extract_strided_slice %125 {offsets = [0, 128], sizes = [8, 64], strides = [1, 1]} : vector<8x256xf32> to vector<8x64xf32>
    %131 = arith.mulf %129, %112 : vector<8x64xf32>
    %132 = arith.mulf %128, %127 : vector<8x64xf32>
    %133 = arith.addf %131, %132 : vector<8x64xf32>
    %134 = math.tanh %133 : vector<8x64xf32>
    %135 = arith.mulf %130, %134 : vector<8x64xf32>
    %c6_i32 = arith.constant 6 : i32
    %c8_i32_34 = arith.constant 8 : i32
    %136 = arith.muli %c6_i32, %c8_i32_34 : i32
    %137 = tpu.assume_multiple %136, 8 : i32
    %138 = arith.index_cast %137 : i32 to index
    %c0_35 = arith.constant 0 : index
    %139 = vector.load %arg6[%138, %c0_35] : memref<64x256xf32, #tpu.memory_space<vmem>>, vector<8x256xf32>
    %cst_36 = arith.constant dense<0.000000e+00> : vector<8x256xf32>
    %140 = tpu.matmul %135, %7, %cst_36 {dimension_numbers = #tpu.dot_dimension_numbers<[1], [0], [0], [1], [0, 0, 1, 1], [], []>} : vector<8x64xf32>, vector<64x256xf32>, vector<8x256xf32> -> vector<8x256xf32>
    %141 = arith.addf %139, %140 : vector<8x256xf32>
    %142 = arith.negf %141 : vector<8x256xf32>
    %143 = math.exp %142 : vector<8x256xf32>
    %cst_37 = arith.constant 1.000000e+00 : f32
    %144 = vector.broadcast %cst_37 : f32 to vector<8x256xf32>
    %145 = arith.addf %144, %143 : vector<8x256xf32>
    %146 = arith.divf %144, %145 : vector<8x256xf32>
    %147 = vector.extract_strided_slice %141 {offsets = [0, 192], sizes = [8, 64], strides = [1, 1]} : vector<8x256xf32> to vector<8x64xf32>
    %148 = math.tanh %147 : vector<8x64xf32>
    %149 = vector.extract_strided_slice %146 {offsets = [0, 0], sizes = [8, 64], strides = [1, 1]} : vector<8x256xf32> to vector<8x64xf32>
    %150 = vector.extract_strided_slice %146 {offsets = [0, 64], sizes = [8, 64], strides = [1, 1]} : vector<8x256xf32> to vector<8x64xf32>
    %151 = vector.extract_strided_slice %146 {offsets = [0, 128], sizes = [8, 64], strides = [1, 1]} : vector<8x256xf32> to vector<8x64xf32>
    %152 = arith.mulf %150, %133 : vector<8x64xf32>
    %153 = arith.mulf %149, %148 : vector<8x64xf32>
    %154 = arith.addf %152, %153 : vector<8x64xf32>
    %155 = math.tanh %154 : vector<8x64xf32>
    %156 = arith.mulf %151, %155 : vector<8x64xf32>
    %c7_i32 = arith.constant 7 : i32
    %c8_i32_38 = arith.constant 8 : i32
    %157 = arith.muli %c7_i32, %c8_i32_38 : i32
    %158 = tpu.assume_multiple %157, 8 : i32
    %159 = arith.index_cast %158 : i32 to index
    %c0_39 = arith.constant 0 : index
    %160 = vector.load %arg6[%159, %c0_39] : memref<64x256xf32, #tpu.memory_space<vmem>>, vector<8x256xf32>
    %cst_40 = arith.constant dense<0.000000e+00> : vector<8x256xf32>
    %161 = tpu.matmul %156, %7, %cst_40 {dimension_numbers = #tpu.dot_dimension_numbers<[1], [0], [0], [1], [0, 0, 1, 1], [], []>} : vector<8x64xf32>, vector<64x256xf32>, vector<8x256xf32> -> vector<8x256xf32>
    %162 = arith.addf %160, %161 : vector<8x256xf32>
    %163 = arith.negf %162 : vector<8x256xf32>
    %164 = math.exp %163 : vector<8x256xf32>
    %cst_41 = arith.constant 1.000000e+00 : f32
    %165 = vector.broadcast %cst_41 : f32 to vector<8x256xf32>
    %166 = arith.addf %165, %164 : vector<8x256xf32>
    %167 = arith.divf %165, %166 : vector<8x256xf32>
    %168 = vector.extract_strided_slice %162 {offsets = [0, 192], sizes = [8, 64], strides = [1, 1]} : vector<8x256xf32> to vector<8x64xf32>
    %169 = math.tanh %168 : vector<8x64xf32>
    %170 = vector.extract_strided_slice %167 {offsets = [0, 0], sizes = [8, 64], strides = [1, 1]} : vector<8x256xf32> to vector<8x64xf32>
    %171 = vector.extract_strided_slice %167 {offsets = [0, 64], sizes = [8, 64], strides = [1, 1]} : vector<8x256xf32> to vector<8x64xf32>
    %172 = vector.extract_strided_slice %167 {offsets = [0, 128], sizes = [8, 64], strides = [1, 1]} : vector<8x256xf32> to vector<8x64xf32>
    %173 = arith.mulf %171, %154 : vector<8x64xf32>
    %174 = arith.mulf %170, %169 : vector<8x64xf32>
    %175 = arith.addf %173, %174 : vector<8x64xf32>
    %176 = math.tanh %175 : vector<8x64xf32>
    %177 = arith.mulf %172, %176 : vector<8x64xf32>
    %c8_i32_42 = arith.constant 8 : i32
    %178 = tpu.concatenate %177, %175 in 1 : vector<8x64xf32>, vector<8x64xf32> -> vector<8x128xf32>
    %c0_43 = arith.constant 0 : index
    %c0_44 = arith.constant 0 : index
    %179 = vector.load %arg5[%c0_43, %c0_44] : memref<8x128xf32, #tpu.memory_space<vmem>>, vector<8x128xf32>
    tpu.vector_store %arg5[%c0_43, %c0_44], %178 {strides = array<i32>} : memref<8x128xf32, #tpu.memory_space<vmem>>, vector<8x128xf32>,
    return
  }
  func.func @transform_0(%arg0: i32) -> (i32, i32) {
    %c0_i32 = arith.constant 0 : i32
    %c0_i32_0 = arith.constant 0 : i32
    %c0_i32_1 = arith.constant 0 : i32
    return %c0_i32, %c0_i32_0 : i32, i32
  }
  func.func @transform_1(%arg0: i32) -> (i32, i32) {
    %c0_i32 = arith.constant 0 : i32
    %c0_i32_0 = arith.constant 0 : i32
    %c0_i32_1 = arith.constant 0 : i32
    return %c0_i32, %c0_i32_0 : i32, i32
  }
  func.func @transform_2(%arg0: i32) -> (i32, i32) {
    %c0_i32 = arith.constant 0 : i32
    %c0_i32_0 = arith.constant 0 : i32
    %c0_i32_1 = arith.constant 0 : i32
    return %c0_i32, %c0_i32_0 : i32, i32
  }
  func.func @transform_3(%arg0: i32) -> (i32, i32) {
    %c0_i32 = arith.constant 0 : i32
    %c0_i32_0 = arith.constant 0 : i32
    %c0_i32_1 = arith.constant 0 : i32
    return %c0_i32, %c0_i32_0 : i32, i32
  }
  func.func @transform_4(%arg0: i32) -> (i32, i32) {
    %c0_i32 = arith.constant 0 : i32
    %c0_i32_0 = arith.constant 0 : i32
    %c0_i32_1 = arith.constant 0 : i32
    return %c0_i32, %c0_i32_0 : i32, i32
  }
}

</mosaic_0001>

<bundles_post_ra>
// kernel: rnn_forward.1
= control target key start
LH: loop header
LB: loop body
LE: loop exit
PB: predicated region body
PF: predicated region fallthrough
CT: control target
= control target key end

     0   :  { %9 = vsyncpa [#allocation4], 0  ;;  %s1451_s15 = smov [#allocation3]   ;;  %s1713_s0 = inlined_call_operand.vmem [shape: f32[64,4], index: 0, kind: input, shape index: {}]   ;;  %s1714_s1 = inlined_call_operand.vmem [shape: f32[4,256], index: 1, kind: input, shape index: {}]   ;;  %s1715_s2 = inlined_call_operand.hbm [shape: f32[64,256], index: 2, kind: input, shape index: {}]   ;;  %s1716_s3 = inlined_call_operand.vmem [shape: f32[1,256], index: 3, kind: input, shape index: {}]   ;;  %s1717_s4 = inlined_call_operand.vmem [shape: f32[8,128], index: 4, kind: output, shape index: {}]  }
   0x1   :  { %s19_s16 = sshll.u32 %s1451_s15, 4  ;;  %s1427_s19 = scalar_lea.hbm %s1715_s2, 2048  ;;  %s20_s16 = int_to_ptr.vmem [resolvable:$true] %s19_s16 }
   0x2   :  { %p1428_p0 = scmp.ne.s32.totalorder %s1715_s2, %s1427_s19  ;;  %p1431_p1 = scmp.lt.u32.totalorder %s1427_s19, %s1715_s2 }
   0x4   :  { %p1433_p2 = pnand %p1431_p1, %p1428_p0 }
   0x6   :  { %1436 = shalt.err (!%p1433_p2)
}
   0x7   :  { %s1437_s24 = scalar_lea.vmem %s20_s16, 2048  ;;  %p1442_p4 = scmp.lt.s32.totalorder %s20_s16, %s20_s16 }
   0x8   :  { %p1438_p3 = scmp.ne.s32.totalorder %s20_s16, %s1437_s24  ;;  %p1443_p5 = scmp.lt.s32.totalorder %s1437_s24, %s1437_s24 }
   0xa   :  { %p1444_p6 = por %p1443_p5, %p1442_p4 }
   0xc   :  { %p1445_p7 = pnand %p1444_p6, %p1438_p3 }
   0xe   :  { %1448 = shalt.err (!%p1445_p7)
}
   0xf   :  { %s1452_s25 = smov 256   ;;  %s1453_s26 = smov 16  }
  0x10   :  { %25 = dma.hbm_to_vmem [thread:$0]  %s1715_s2, 2048, %s20_s16, [#allocation4], %s1452_s25, %s1452_s25, %s1453_s26  }
  0x11   :  { %1449 = dma.done.wait [#allocation4], 2048  }
  0x12   :  { %1450 = vsyncadd [#allocation4], 4294965248  ;;  %v1454_v0 = vmov 0.0   ;;  %v39_v1 = vld [vmem:[%s1714_s1] sm:$0xff]  ;;  %vm79_vm0 = vcmask 1043456   ;;  %v214_v2 = vld [vmem:[#allocation3 + $0x8] sm:$0xff]  ;;  %v42_v39 = vlaneseq }
  0x13   :  { %148 = vmatprep.mubr.f32.mxu1 %v1454_v0  ;;  %635 = vmatprep.mubr.f32.mxu0 %v1454_v0  ;;  %v53_v3 = vcombine.high %v39_v1, %v39_v1  ;;  %v216_v4 = vld [vmem:[#allocation3 + $0x18] sm:$0xff]  ;;  %v213_v5 = vld [vmem:[#allocation3] sm:$0xff]  ;;  %v215_v6 = vld [vmem:[#allocation3 + $0x10] sm:$0xff]  ;;  %vm54_vm1 = vcmask 31744   ;;  %s1455_s20 = smov 64   ;;  %vm234_vm2 = vcmask 523264  }
  0x14   :  { %v31_v7 = vld [vmem:[%s1713_s0] sm:$0xff]  ;;  %v1501_v8 = vpack.c.bf16 %v216_v4, %v214_v2  ;;  %v1503_v9 = vpack.c.bf16 %v215_v6, %v213_v5  ;;  %v218_v10 = vld [vmem:[#allocation3 + $0x28] sm:$0xff]  ;;  %v220_v11 = vld [vmem:[#allocation3 + $0x38] sm:$0xff]  ;;  %v43_v42 = vshrl.u32 %v42_v39, 7 }
  0x15   :  { %1132 = vmatprep.subr.msk.mxu1 %vm79_vm0, %v53_v3  ;;  %v217_v12 = vld [vmem:[#allocation3 + $0x20] sm:$0xff]  ;;  %v219_v13 = vld [vmem:[#allocation3 + $0x30] sm:$0xff]  ;;  %v1505_v14 = vpack.c.bf16 %v220_v11, %v218_v10  ;;  %v222_v15 = vld [vmem:[#allocation3 + $0x48] sm:$0xff] }
  0x16   :  { %1133 = vmatpush1.msk.msra.mxu1 %vm79_vm0, %v39_v1  ;;  %1214 = vmatprep.subr.bf16.mxu0 %v1501_v8  ;;  %v224_v16 = vld [vmem:[#allocation3 + $0x58] sm:$0xff]  ;;  %v32_v17 = vld [vmem:[%s1713_s0 + $0x8] sm:$0xff]  ;;  %v1515_v18 = vpack.c.bf16 %v219_v13, %v217_v12  ;;  %v221_v20 = vld [vmem:[#allocation3 + $0x40] sm:$0xff]  ;;  %v48_v45 = vsub.s32 1, %v43_v42  ;;  %v44_v54 = vsub.s32 0, %v43_v42 }
  0x17   :  { %1134 = vmatmul.mubr.msk.f32.vlgmr.msra.gmra.mrb[0].mxu1 %vm54_vm1, %v31_v7  ;;  %1166 = vmatprep.subr.bf16.mxu1 %v1501_v8  ;;  %v1518_v19 = vpack.c.bf16 %v224_v16, %v222_v15  ;;  %v223_v21 = vld [vmem:[#allocation3 + $0x50] sm:$0xff]  ;;  %v226_v22 = vld [vmem:[#allocation3 + $0x68] sm:$0xff]  ;;  %v228_v23 = vld [vmem:[#allocation3 + $0x78] sm:$0xff] }
  0x18   :  { %1168 = vmatpush1.bf16.msra.mxu1 %v1503_v9  ;;  %154 = vmatprep.mubr.f32.mxu1 %v1454_v0  ;;  %v33_v24 = vld [vmem:[%s1713_s0 + $0x10] sm:$0xff]  ;;  %v1528_v25 = vpack.c.bf16 %v223_v21, %v221_v20  ;;  %v1531_v26 = vpack.c.bf16 %v228_v23, %v226_v22  ;;  %v225_v27 = vld [vmem:[#allocation3 + $0x60] sm:$0xff]  ;;  %v34_v29 = vld [vmem:[%s1713_s0 + $0x18] sm:$0xff] }
  0x19   :  { %1170 = vmatprep.subr.bf16.mxu1 %v1505_v14  ;;  %1216 = vmatpush1.bf16.msra.mxu0 %v1503_v9  ;;  %v227_v28 = vld [vmem:[#allocation3 + $0x70] sm:$0xff]  ;;  %v35_v31 = vld [vmem:[%s1713_s0 + $0x20] sm:$0xff]  ;;  %v36_v32 = vld [vmem:[%s1713_s0 + $0x28] sm:$0xff] }
  0x1a   :  { %1218 = vmatprep.subr.bf16.mxu0 %v1505_v14  ;;  %v1541_v30 = vpack.c.bf16 %v227_v28, %v225_v27  ;;  %v37_v33 = vld [vmem:[%s1713_s0 + $0x30] sm:$0xff]  ;;  %v38_v34 = vld [vmem:[%s1713_s0 + $0x38] sm:$0xff]  ;;  %v40_v47 = vld [vmem:[%s1716_s3] sm:$0x3] }
  0x1b   :  { %1135 = vmatmul.mubr.msk.f32.gmra.mrb[2].mxu1 %vm54_vm1, %v32_v17  ;;  %v1605_v49 = vrot.slane %v40_v47, %v48_v45  ;;  %v1609_v55 = vrot.slane %v40_v47, %v44_v54 }
  0x1c   :  { %160 = vmatprep.mubr.f32.mxu1 %v1454_v0  ;;  %1172 = vmatpush1.bf16.msra.mxu1 %v1515_v18 }
  0x1d   :  { %1174 = vmatprep.subr.bf16.mxu1 %v1518_v19  ;;  %1220 = vmatpush1.bf16.msra.mxu0 %v1515_v18 }
  0x1e   :  { %1222 = vmatprep.subr.bf16.mxu0 %v1518_v19 }
  0x1f   :  { %1136 = vmatmul.mubr.msk.f32.gmra.mrb[4].mxu1 %vm54_vm1, %v33_v24 }
  0x20   :  { %166 = vmatprep.mubr.f32.mxu1 %v1454_v0  ;;  %1176 = vmatpush1.bf16.msra.mxu1 %v1528_v25 }
  0x21   :  { %1178 = vmatprep.subr.bf16.mxu1 %v1531_v26  ;;  %1224 = vmatpush1.bf16.msra.mxu0 %v1528_v25 }
  0x22   :  { %1226 = vmatprep.subr.bf16.mxu0 %v1531_v26 }
  0x23   :  { %1137 = vmatmul.mubr.msk.f32.gmra.mrb[6].mxu1 %vm54_vm1, %v34_v29 }
  0x24   :  { %172 = vmatprep.mubr.f32.mxu1 %v1454_v0  ;;  %1180 = vmatpush1.bf16.msra.mxu1 %v1541_v30 }
  0x25   :  { %1182 = vmatprep.subr.bf16.mxu1 %v1501_v8  ;;  %1228 = vmatpush1.bf16.msra.mxu0 %v1541_v30 }
  0x26   :  { %1230 = vmatprep.subr.bf16.mxu0 %v1501_v8 }
  0x27   :  { %1138 = vmatmul.mubr.msk.f32.gmra.mrb[8].mxu1 %vm54_vm1, %v35_v31 }
  0x28   :  { %178 = vmatprep.mubr.f32.mxu1 %v1454_v0 }
  0x2b   :  { %1139 = vmatmul.mubr.msk.f32.gmra.mrb[10].mxu1 %vm54_vm1, %v36_v32 }
  0x2c   :  { %184 = vmatprep.mubr.f32.mxu1 %v1454_v0 }
  0x2f   :  { %1140 = vmatmul.mubr.msk.f32.gmra.mrb[12].mxu1 %vm54_vm1, %v37_v33 }
  0x30   :  { %190 = vmatprep.mubr.f32.mxu1 %v1454_v0 }
  0x33   :  { %1141 = vmatmul.mubr.msk.f32.gmra.mrb[14].mxu1 %vm54_vm1, %v38_v34 }
  0x34   :  { %302 = vmatprep.mubr.f32.mxu1 %v1454_v0 }
  0x37   :  { %303 = vmatmul.mubr.f32.vlgmr.msra.gmra.mrb[0].mxu1 %v1454_v0 }
  0x38   :  { %1184 = vmatpush1.bf16.msra.mxu1 %v1503_v9  ;;  %413 = vmatprep.mubr.f32.mxu1 %v1454_v0 }
  0x39   :  { %1186 = vmatprep.subr.bf16.mxu1 %v1505_v14 }
  0x3c   :  { %1188 = vmatpush1.bf16.msra.mxu1 %v1515_v18 }
  0x3d   :  { %1190 = vmatprep.subr.bf16.mxu1 %v1518_v19 }
  0x40   :  { %1192 = vmatpush1.bf16.msra.mxu1 %v1528_v25 }
  0x41   :  { %1194 = vmatprep.subr.bf16.mxu1 %v1531_v26 }
  0x44   :  { %1196 = vmatpush1.bf16.msra.mxu1 %v1541_v30 }
  0x45   :  { %1198 = vmatprep.subr.bf16.mxu1 %v1501_v8 }
  0xf6   :  { %v1582_v35 = vpop.f32.mrb[6].mxu1 }
  0xf7   :  { %v1584_v36 = vpop.f32.mrb[7].mxu1 }
  0xfa   :  { %v1586_v37 = vpop.f32.mrb[8].mxu1 }
  0xfb   :  { %v1588_v38 = vpop.f32.mrb[9].mxu1 }
  0xfe   :  { %v1590_v40 = vpop.f32.mrb[10].mxu1 }
  0xff   :  { %v1592_v41 = vpop.f32.mrb[11].mxu1 }
 0x102   :  { %v1594_v43 = vpop.f32.mrb[12].mxu1 }
 0x103   :  { %v1596_v44 = vpop.f32.mrb[13].mxu1 }
 0x106   :  { %v1598_v46 = vpop.f32.mrb[14].mxu1 }
 0x107   :  { %v1603_v48 = vpop.f32.mrb[15].mxu1 }
 0x10a   :  { %v304_v50 = vpop.f32.mrb[0].mxu1 }
 0x10b   :  { %v306_v51 = vpop.f32.mrb[1].mxu1  ;;  %v1293_v56 = vadd.f32 %v304_v50, %v1609_v55 }
 0x10c   :  { %v1294_v52 = vadd.f32 %v306_v51, %v1605_v49 }
 0x10d   :  { %v1142_v57 = vmul.f32 -1.442695, %v1293_v56 }
 0x10e   :  { %1331 = vtanh.f32 %v1294_v52  ;;  %v1143_v4 = vmul.f32 -1.442695, %v1294_v52 }
 0x10f   :  { %1333 = vpow2.f32 %v1142_v57 }
 0x118   :  { %v1332_v53 = vpop.eup %1331 }
 0x119   :  { %326 = vrot.lane.b32.xlu0 %v1332_v53, %s1455_s20  ;;  %v1334_v58 = vpop.eup %1333 }
 0x11a   :  { %v317_v59 = vadd.f32 1.0, %v1334_v58 }
 0x11c   :  { %1335 = vrcp.f32 %v317_v59 }
 0x126   :  { %v1336_v60 = vpop.eup %1335 }
 0x127   :  { %v324_v63 = vmul.f32 0.0, %v1336_v60 }
 0x18b   :  { %v327_v61 = vpop.permute.xlu0 %326 }
 0x18c   :  { %v329_v62 = vmul.f32 %v1336_v60, %v327_v61 }
 0x18e   :  { %331 = vrot.lane.b32.xlu0 %v329_v62, %s1455_s20 }
 0x200   :  { %v332_v1 = vpop.permute.xlu0 %331 }
 0x201   :  { %v334_v2 = vadd.f32 %v332_v1, %v324_v63 }
 0x203   :  { %1337 = vtanh.f32 %v334_v2 }
 0x204   :  { %1339 = vpow2.f32 %v1143_v4 }
 0x20d   :  { %v1338_v3 = vpop.eup %1337 }
 0x20e   :  { %337 = vrot.lane.b32.xlu1 %v1338_v3, %s1455_s20  ;;  %v1340_v5 = vpop.eup %1339 }
 0x20f   :  { %v318_v6 = vadd.f32 1.0, %v1340_v5 }
 0x211   :  { %1341 = vrcp.f32 %v318_v6 }
 0x21b   :  { %v1342_v7 = vpop.eup %1341 }
 0x280   :  { %v338_v10 = vpop.permute.xlu1 %337 }
 0x281   :  { %v340_v11 = vmul.f32 %v1342_v7, %v338_v10 }
 0x283   :  { %1144 = vmatmul.mubr.msk.f32.vlgmr.msra.gmra.mrb[2].mxu1 %vm234_vm2, %v340_v11  ;;  %v169_v11 = vadd.f32 %v1582_v35, %v1609_v55 }
 0x284   :  { %1200 = vmatpush1.bf16.msra.mxu1 %v1503_v9  ;;  %524 = vmatprep.mubr.f32.mxu1 %v1454_v0 }
 0x285   :  { %1202 = vmatprep.subr.bf16.mxu1 %v1505_v14 }
 0x288   :  { %1204 = vmatpush1.bf16.msra.mxu1 %v1515_v18 }
 0x289   :  { %1206 = vmatprep.subr.bf16.mxu1 %v1518_v19 }
 0x28c   :  { %1208 = vmatpush1.bf16.msra.mxu1 %v1528_v25 }
 0x28d   :  { %1210 = vmatprep.subr.bf16.mxu1 %v1531_v26 }
 0x290   :  { %1212 = vmatpush1.bf16.msra.mxu1 %v1541_v30 }
 0x356   :  { %v415_v12 = vpop.f32.mrb[2].mxu1 }
 0x357   :  { %v417_v13 = vpop.f32.mrb[3].mxu1  ;;  %v1295_v17 = vadd.f32 %v415_v12, %v1609_v55  ;;  %v171_v12 = vadd.f32 %v1584_v36, %v1605_v49 }
 0x358   :  { %v1296_v15 = vadd.f32 %v417_v13, %v1605_v49 }
 0x359   :  { %v1145_v20 = vmul.f32 -1.442695, %v1295_v17 }
 0x35a   :  { %1343 = vtanh.f32 %v1296_v15  ;;  %v1146_v33 = vmul.f32 -1.442695, %v1296_v15 }
 0x35b   :  { %1345 = vpow2.f32 %v1145_v20 }
 0x364   :  { %v1344_v16 = vpop.eup %1343 }
 0x365   :  { %437 = vrot.lane.b32.xlu1 %v1344_v16, %s1455_s20  ;;  %v1346_v21 = vpop.eup %1345 }
 0x366   :  { %v428_v22 = vadd.f32 1.0, %v1346_v21 }
 0x368   :  { %1347 = vrcp.f32 %v428_v22 }
 0x372   :  { %v1348_v23 = vpop.eup %1347 }
 0x373   :  { %v435_v28 = vmul.f32 %v1348_v23, %v334_v2 }
 0x3d7   :  { %v438_v24 = vpop.permute.xlu1 %437 }
 0x3d8   :  { %v440_v27 = vmul.f32 %v1348_v23, %v438_v24 }
 0x3da   :  { %442 = vrot.lane.b32.xlu0 %v440_v27, %s1455_s20 }
 0x44c   :  { %v443_v29 = vpop.permute.xlu0 %442 }
 0x44d   :  { %v445_v31 = vadd.f32 %v443_v29, %v435_v28 }
 0x44f   :  { %1349 = vtanh.f32 %v445_v31 }
 0x450   :  { %1351 = vpow2.f32 %v1146_v33 }
 0x459   :  { %v1350_v32 = vpop.eup %1349 }
 0x45a   :  { %448 = vrot.lane.b32.xlu1 %v1350_v32, %s1455_s20  ;;  %v1352_v34 = vpop.eup %1351 }
 0x45b   :  { %v429_v39 = vadd.f32 1.0, %v1352_v34 }
 0x45d   :  { %1353 = vrcp.f32 %v429_v39 }
 0x467   :  { %v1354_v42 = vpop.eup %1353 }
 0x4cc   :  { %v449_v45 = vpop.permute.xlu1 %448 }
 0x4cd   :  { %v451_v47 = vmul.f32 %v1354_v42, %v449_v45 }
 0x4cf   :  { %1147 = vmatmul.mubr.msk.f32.vlgmr.msra.gmra.mrb[4].mxu1 %vm234_vm2, %v451_v47  ;;  %v175_v47 = vadd.f32 %v1586_v37, %v1609_v55 }
 0x5a2   :  { %v526_v50 = vpop.f32.mrb[4].mxu1 }
 0x5a3   :  { %v528_v51 = vpop.f32.mrb[5].mxu1  ;;  %v1297_v54 = vadd.f32 %v526_v50, %v1609_v55  ;;  %v177_v50 = vadd.f32 %v1588_v38, %v1605_v49 }
 0x5a4   :  { %v1298_v52 = vadd.f32 %v528_v51, %v1605_v49 }
 0x5a5   :  { %v1148_v56 = vmul.f32 -1.442695, %v1297_v54 }
 0x5a6   :  { %1355 = vtanh.f32 %v1298_v52  ;;  %v1149_v3 = vmul.f32 -1.442695, %v1298_v52 }
 0x5a7   :  { %1357 = vpow2.f32 %v1148_v56 }
 0x5b0   :  { %v1356_v53 = vpop.eup %1355 }
 0x5b1   :  { %548 = vrot.lane.b32.xlu0 %v1356_v53, %s1455_s20  ;;  %v1358_v57 = vpop.eup %1357 }
 0x5b2   :  { %v539_v58 = vadd.f32 1.0, %v1358_v57 }
 0x5b4   :  { %1359 = vrcp.f32 %v539_v58 }
 0x5be   :  { %v1360_v59 = vpop.eup %1359 }
 0x5bf   :  { %v546_v62 = vmul.f32 %v1360_v59, %v445_v31 }
 0x623   :  { %v549_v60 = vpop.permute.xlu0 %548 }
 0x624   :  { %v551_v61 = vmul.f32 %v1360_v59, %v549_v60 }
 0x626   :  { %553 = vrot.lane.b32.xlu1 %v551_v61, %s1455_s20 }
 0x698   :  { %v554_v63 = vpop.permute.xlu1 %553 }
 0x699   :  { %v556_v1 = vadd.f32 %v554_v63, %v546_v62 }
 0x69b   :  { %1361 = vtanh.f32 %v556_v1 }
 0x69c   :  { %1363 = vpow2.f32 %v1149_v3 }
 0x6a5   :  { %v1362_v2 = vpop.eup %1361 }
 0x6a6   :  { %559 = vrot.lane.b32.xlu0 %v1362_v2, %s1455_s20  ;;  %v1364_v4 = vpop.eup %1363 }
 0x6a7   :  { %v540_v5 = vadd.f32 1.0, %v1364_v4 }
 0x6a9   :  { %1365 = vrcp.f32 %v540_v5 }
 0x6b3   :  { %v1366_v6 = vpop.eup %1365 }
 0x718   :  { %v560_v7 = vpop.permute.xlu0 %559 }
 0x719   :  { %v562_v10 = vmul.f32 %v1366_v6, %v560_v7 }
 0x71b   :  { %1150 = vmatmul.mubr.msk.f32.vlgmr.msra.gmra.mrb[0].mxu0 %vm234_vm2, %v562_v10  ;;  %v181_v10 = vadd.f32 %v1590_v40, %v1609_v55 }
 0x71c   :  { %1232 = vmatpush1.bf16.msra.mxu0 %v1503_v9  ;;  %746 = vmatprep.mubr.f32.mxu0 %v1454_v0 }
 0x71d   :  { %1234 = vmatprep.subr.bf16.mxu0 %v1505_v14 }
 0x720   :  { %1236 = vmatpush1.bf16.msra.mxu0 %v1515_v18 }
 0x721   :  { %1238 = vmatprep.subr.bf16.mxu0 %v1518_v19 }
 0x724   :  { %1240 = vmatpush1.bf16.msra.mxu0 %v1528_v25 }
 0x725   :  { %1242 = vmatprep.subr.bf16.mxu0 %v1531_v26 }
 0x728   :  { %1244 = vmatpush1.bf16.msra.mxu0 %v1541_v30 }
 0x729   :  { %1246 = vmatprep.subr.bf16.mxu0 %v1501_v8 }
 0x7ee   :  { %v637_v13 = vpop.f32.mrb[0].mxu0 }
 0x7ef   :  { %v642_v15 = vadd.f32 %v637_v13, %v169_v11  ;;  %v639_v16 = vpop.f32.mrb[1].mxu0  ;;  %v183_v11 = vadd.f32 %v1592_v41, %v1605_v49 }
 0x7f0   :  { %v643_v17 = vadd.f32 %v639_v16, %v171_v12 }
 0x7f1   :  { %v1151_v21 = vmul.f32 -1.442695, %v642_v15 }
 0x7f2   :  { %1367 = vtanh.f32 %v643_v17  ;;  %v1152_v32 = vmul.f32 -1.442695, %v643_v17 }
 0x7f3   :  { %1369 = vpow2.f32 %v1151_v21 }
 0x7fc   :  { %v1368_v20 = vpop.eup %1367 }
 0x7fd   :  { %659 = vrot.lane.b32.xlu1 %v1368_v20, %s1455_s20  ;;  %v1370_v22 = vpop.eup %1369 }
 0x7fe   :  { %v650_v23 = vadd.f32 1.0, %v1370_v22 }
 0x800   :  { %1371 = vrcp.f32 %v650_v23 }
 0x80a   :  { %v1372_v24 = vpop.eup %1371 }
 0x80b   :  { %v657_v35 = vmul.f32 %v1372_v24, %v556_v1 }
 0x86f   :  { %v660_v27 = vpop.permute.xlu1 %659 }
 0x870   :  { %v662_v28 = vmul.f32 %v1372_v24, %v660_v27 }
 0x872   :  { %664 = vrot.lane.b32.xlu0 %v662_v28, %s1455_s20 }
 0x8e4   :  { %v665_v36 = vpop.permute.xlu0 %664 }
 0x8e5   :  { %v667_v29 = vadd.f32 %v665_v36, %v657_v35 }
 0x8e7   :  { %1373 = vtanh.f32 %v667_v29 }
 0x8e8   :  { %1375 = vpow2.f32 %v1152_v32 }
 0x8f1   :  { %v1374_v31 = vpop.eup %1373 }
 0x8f2   :  { %670 = vrot.lane.b32.xlu1 %v1374_v31, %s1455_s20  ;;  %v1376_v33 = vpop.eup %1375 }
 0x8f3   :  { %v651_v34 = vadd.f32 1.0, %v1376_v33 }
 0x8f5   :  { %1377 = vrcp.f32 %v651_v34  ;;  %v187_v34 = vadd.f32 %v1594_v43, %v1609_v55 }
 0x8ff   :  { %v1378_v39 = vpop.eup %1377 }
 0x964   :  { %v671_v42 = vpop.permute.xlu1 %670 }
 0x965   :  { %v673_v45 = vmul.f32 %v1378_v39, %v671_v42 }
 0x967   :  { %1153 = vmatmul.mubr.msk.f32.vlgmr.msra.gmra.mrb[2].mxu0 %vm234_vm2, %v673_v45 }
 0x968   :  { %1248 = vmatpush1.bf16.msra.mxu0 %v1503_v9  ;;  %857 = vmatprep.mubr.f32.mxu0 %v1454_v0 }
 0x969   :  { %1250 = vmatprep.subr.bf16.mxu0 %v1505_v14 }
 0x96c   :  { %1252 = vmatpush1.bf16.msra.mxu0 %v1515_v18 }
 0x96d   :  { %1254 = vmatprep.subr.bf16.mxu0 %v1518_v19 }
 0x970   :  { %1256 = vmatpush1.bf16.msra.mxu0 %v1528_v25 }
 0x971   :  { %1258 = vmatprep.subr.bf16.mxu0 %v1531_v26 }
 0x974   :  { %1260 = vmatpush1.bf16.msra.mxu0 %v1541_v30 }
 0x975   :  { %1262 = vmatprep.subr.bf16.mxu0 %v1501_v8 }
 0xa3a   :  { %v748_v51 = vpop.f32.mrb[2].mxu0 }
 0xa3b   :  { %v753_v52 = vadd.f32 %v748_v51, %v175_v47  ;;  %v750_v53 = vpop.f32.mrb[3].mxu0 }
 0xa3c   :  { %v754_v54 = vadd.f32 %v750_v53, %v177_v50 }
 0xa3d   :  { %v1154_v57 = vmul.f32 -1.442695, %v753_v52 }
 0xa3e   :  { %1379 = vtanh.f32 %v754_v54  ;;  %v1155_v2 = vmul.f32 -1.442695, %v754_v54 }
 0xa3f   :  { %1381 = vpow2.f32 %v1154_v57 }
 0xa48   :  { %v1380_v56 = vpop.eup %1379 }
 0xa49   :  { %770 = vrot.lane.b32.xlu0 %v1380_v56, %s1455_s20  ;;  %v1382_v58 = vpop.eup %1381 }
 0xa4a   :  { %v761_v59 = vadd.f32 1.0, %v1382_v58 }
 0xa4c   :  { %1383 = vrcp.f32 %v761_v59  ;;  %v193_v59 = vadd.f32 %v1598_v46, %v1609_v55 }
 0xa56   :  { %v1384_v60 = vpop.eup %1383 }
 0xa57   :  { %v768_v37 = vmul.f32 %v1384_v60, %v667_v29 }
 0xabb   :  { %v771_v61 = vpop.permute.xlu0 %770 }
 0xabc   :  { %v773_v62 = vmul.f32 %v1384_v60, %v771_v61  ;;  %v195_v60 = vadd.f32 %v1603_v48, %v1605_v49 }
 0xabe   :  { %775 = vrot.lane.b32.xlu1 %v773_v62, %s1455_s20 }
 0xb30   :  { %v776_v38 = vpop.permute.xlu1 %775 }
 0xb31   :  { %v778_v63 = vadd.f32 %v776_v38, %v768_v37 }
 0xb33   :  { %1385 = vtanh.f32 %v778_v63 }
 0xb34   :  { %1387 = vpow2.f32 %v1155_v2 }
 0xb3d   :  { %v1386_v1 = vpop.eup %1385 }
 0xb3e   :  { %781 = vrot.lane.b32.xlu0 %v1386_v1, %s1455_s20  ;;  %v1388_v3 = vpop.eup %1387 }
 0xb3f   :  { %v762_v4 = vadd.f32 1.0, %v1388_v3 }
 0xb41   :  { %1389 = vrcp.f32 %v762_v4 }
 0xb4b   :  { %v1390_v5 = vpop.eup %1389 }
 0xbb0   :  { %v782_v6 = vpop.permute.xlu0 %781 }
 0xbb1   :  { %v784_v7 = vmul.f32 %v1390_v5, %v782_v6 }
 0xbb3   :  { %1156 = vmatmul.mubr.msk.f32.vlgmr.msra.gmra.mrb[4].mxu0 %vm234_vm2, %v784_v7 }
 0xbb4   :  { %1264 = vmatpush1.bf16.msra.mxu0 %v1503_v9  ;;  %968 = vmatprep.mubr.f32.mxu0 %v1454_v0 }
 0xbb5   :  { %1266 = vmatprep.subr.bf16.mxu0 %v1505_v14 }
 0xbb8   :  { %1268 = vmatpush1.bf16.msra.mxu0 %v1515_v18 }
 0xbb9   :  { %1270 = vmatprep.subr.bf16.mxu0 %v1518_v19 }
 0xbbc   :  { %1272 = vmatpush1.bf16.msra.mxu0 %v1528_v25 }
 0xbbd   :  { %1274 = vmatprep.subr.bf16.mxu0 %v1531_v26 }
 0xbc0   :  { %1276 = vmatpush1.bf16.msra.mxu0 %v1541_v30 }
 0xbc1   :  { %1278 = vmatprep.subr.bf16.mxu0 %v1501_v8 }
 0xc86   :  { %v859_v12 = vpop.f32.mrb[4].mxu0 }
 0xc87   :  { %v864_v13 = vadd.f32 %v859_v12, %v181_v10  ;;  %v861_v15 = vpop.f32.mrb[5].mxu0 }
 0xc88   :  { %v865_v16 = vadd.f32 %v861_v15, %v183_v11 }
 0xc89   :  { %v1157_v20 = vmul.f32 -1.442695, %v864_v13 }
 0xc8a   :  { %1391 = vtanh.f32 %v865_v16  ;;  %v1158_v35 = vmul.f32 -1.442695, %v865_v16 }
 0xc8b   :  { %1393 = vpow2.f32 %v1157_v20 }
 0xc94   :  { %v1392_v17 = vpop.eup %1391 }
 0xc95   :  { %881 = vrot.lane.b32.xlu1 %v1392_v17, %s1455_s20  ;;  %v1394_v21 = vpop.eup %1393 }
 0xc96   :  { %v872_v22 = vadd.f32 1.0, %v1394_v21 }
 0xc98   :  { %1395 = vrcp.f32 %v872_v22 }
 0xca2   :  { %v1396_v8 = vpop.eup %1395 }
 0xca3   :  { %v879_v40 = vmul.f32 %v1396_v8, %v778_v63 }
 0xd07   :  { %v882_v23 = vpop.permute.xlu1 %881 }
 0xd08   :  { %v884_v24 = vmul.f32 %v1396_v8, %v882_v23 }
 0xd0a   :  { %886 = vrot.lane.b32.xlu0 %v884_v24, %s1455_s20 }
 0xd7c   :  { %v887_v41 = vpop.permute.xlu0 %886 }
 0xd7d   :  { %v889_v27 = vadd.f32 %v887_v41, %v879_v40 }
 0xd7f   :  { %1397 = vtanh.f32 %v889_v27 }
 0xd80   :  { %1399 = vpow2.f32 %v1158_v35 }
 0xd89   :  { %v1398_v28 = vpop.eup %1397 }
 0xd8a   :  { %892 = vrot.lane.b32.xlu1 %v1398_v28, %s1455_s20  ;;  %v1400_v36 = vpop.eup %1399 }
 0xd8b   :  { %v873_v29 = vadd.f32 1.0, %v1400_v36 }
 0xd8d   :  { %1401 = vrcp.f32 %v873_v29 }
 0xd97   :  { %v1402_v31 = vpop.eup %1401 }
 0xdfc   :  { %v893_v32 = vpop.permute.xlu1 %892 }
 0xdfd   :  { %v895_v33 = vmul.f32 %v1402_v31, %v893_v32 }
 0xdff   :  { %1159 = vmatmul.mubr.msk.f32.vlgmr.msra.gmra.mrb[6].mxu0 %vm234_vm2, %v895_v33 }
 0xe00   :  { %1280 = vmatpush1.bf16.msra.mxu0 %v1503_v9  ;;  %1079 = vmatprep.mubr.f32.mxu0 %v1454_v0  ;;  %v189_v9 = vadd.f32 %v1596_v44, %v1605_v49 }
 0xe01   :  { %1282 = vmatprep.subr.bf16.mxu0 %v1505_v14 }
 0xe04   :  { %1284 = vmatpush1.bf16.msra.mxu0 %v1515_v18 }
 0xe05   :  { %1286 = vmatprep.subr.bf16.mxu0 %v1518_v19 }
 0xe08   :  { %1288 = vmatpush1.bf16.msra.mxu0 %v1528_v25 }
 0xe09   :  { %1290 = vmatprep.subr.bf16.mxu0 %v1531_v26 }
 0xe0c   :  { %1292 = vmatpush1.bf16.msra.mxu0 %v1541_v30 }
 0xed2   :  { %v970_v39 = vpop.f32.mrb[6].mxu0 }
 0xed3   :  { %v975_v0 = vadd.f32 %v970_v39, %v187_v34  ;;  %v972_v42 = vpop.f32.mrb[7].mxu0 }
 0xed4   :  { %v976_v14 = vadd.f32 %v972_v42, %v189_v9 }
 0xed5   :  { %v1160_v19 = vmul.f32 -1.442695, %v975_v0 }
 0xed6   :  { %1403 = vtanh.f32 %v976_v14  ;;  %v1161_v52 = vmul.f32 -1.442695, %v976_v14 }
 0xed7   :  { %1405 = vpow2.f32 %v1160_v19 }
 0xee0   :  { %v1404_v18 = vpop.eup %1403 }
 0xee1   :  { %992 = vrot.lane.b32.xlu0 %v1404_v18, %s1455_s20  ;;  %v1406_v25 = vpop.eup %1405 }
 0xee2   :  { %v983_v26 = vadd.f32 1.0, %v1406_v25 }
 0xee4   :  { %1407 = vrcp.f32 %v983_v26 }
 0xeee   :  { %v1408_v30 = vpop.eup %1407 }
 0xeef   :  { %v990_v43 = vmul.f32 %v1408_v30, %v889_v27 }
 0xf53   :  { %v993_v45 = vpop.permute.xlu0 %992 }
 0xf54   :  { %v995_v47 = vmul.f32 %v1408_v30, %v993_v45 }
 0xf56   :  { %997 = vrot.lane.b32.xlu1 %v995_v47, %s1455_s20 }
 0xfc8   :  { %v998_v44 = vpop.permute.xlu1 %997 }
 0xfc9   :  { %v1000_v50 = vadd.f32 %v998_v44, %v990_v43 }
 0xfcb   :  { %1409 = vtanh.f32 %v1000_v50 }
 0xfcc   :  { %1411 = vpow2.f32 %v1161_v52 }
 0xfd5   :  { %v1410_v51 = vpop.eup %1409 }
 0xfd6   :  { %1003 = vrot.lane.b32.xlu0 %v1410_v51, %s1455_s20  ;;  %v1412_v53 = vpop.eup %1411 }
 0xfd7   :  { %v984_v54 = vadd.f32 1.0, %v1412_v53 }
 0xfd9   :  { %1413 = vrcp.f32 %v984_v54 }
 0xfe3   :  { %v1414_v56 = vpop.eup %1413 }
0x1048   :  { %v1004_v57 = vpop.permute.xlu0 %1003 }
0x1049   :  { %v1006_v58 = vmul.f32 %v1414_v56, %v1004_v57 }
0x104b   :  { %1162 = vmatmul.mubr.msk.f32.vlgmr.msra.gmra.mrb[8].mxu0 %vm234_vm2, %v1006_v58 }
0x111e   :  { %v1081_v61 = vpop.f32.mrb[8].mxu0 }
0x111f   :  { %v1086_v62 = vadd.f32 %v1081_v61, %v193_v59  ;;  %v1083_v37 = vpop.f32.mrb[9].mxu0 }
0x1120   :  { %v1087_v38 = vadd.f32 %v1083_v37, %v195_v60 }
0x1121   :  { %v1163_v1 = vmul.f32 -1.442695, %v1086_v62 }
0x1122   :  { %1415 = vtanh.f32 %v1087_v38  ;;  %v1164_v7 = vmul.f32 -1.442695, %v1087_v38 }
0x1123   :  { %1417 = vpow2.f32 %v1163_v1 }
0x112c   :  { %v1416_v63 = vpop.eup %1415 }
0x112d   :  { %1103 = vrot.lane.b32.xlu1 %v1416_v63, %s1455_s20  ;;  %v1418_v2 = vpop.eup %1417 }
0x112e   :  { %v1094_v3 = vadd.f32 1.0, %v1418_v2 }
0x1130   :  { %1419 = vrcp.f32 %v1094_v3 }
0x113a   :  { %v1420_v4 = vpop.eup %1419 }
0x113b   :  { %v1101_v46 = vmul.f32 %v1420_v4, %v1000_v50 }
0x119f   :  { %v1104_v5 = vpop.permute.xlu1 %1103 }
0x11a0   :  { %v1106_v6 = vmul.f32 %v1420_v4, %v1104_v5 }
0x11a2   :  { %1108 = vrot.lane.b32.xlu0 %v1106_v6, %s1455_s20 }
0x1214   :  { %v1109_v48 = vpop.permute.xlu0 %1108 }
0x1215   :  { %v1111_v49 = vadd.f32 %v1109_v48, %v1101_v46 }
0x1217   :  { %1421 = vtanh.f32 %v1111_v49 }
0x1218   :  { %1423 = vpow2.f32 %v1164_v7 }
0x1221   :  { %v1422_v55 = vpop.eup %1421 }
0x1222   :  { %1114 = vrot.lane.b32.xlu1 %v1422_v55, %s1455_s20  ;;  %v1424_v10 = vpop.eup %1423 }
0x1223   :  { %v1095_v11 = vadd.f32 1.0, %v1424_v10 }
0x1225   :  { %1425 = vrcp.f32 %v1095_v11 }
0x122f   :  { %v1426_v12 = vpop.eup %1425 }
0x1294   :  { %v1115_v13 = vpop.permute.xlu1 %1114 }
0x1295   :  { %v1117_v15 = vmul.f32 %v1426_v12, %v1115_v13 }
0x1297   :  { %v1118_v16 = vsel %vm234_vm2, %v1117_v15, %v1111_v49 }
0x1298   :  { %1119 = vst [vmem:[%s1717_s4] sm:$0xff] %v1118_v16 }
0x1299   :  { %1124 = vsyncpa [#allocation4], 1 }

</bundles_post_ra>
